<compile_context>
chip_gen: v5e
topology: v5e:2x2
jax: 0.10.0
libtpu: 0.0.40
codegen_flags: <defaults>
</compile_context>

<pallas_src>
import math

import jax
import jax.numpy as jnp
from jax.experimental import pallas as pl
from jax.experimental.pallas import tpu as pltpu


def _scale_shift_kernel(x_ref, w_ref, b_ref, o_ref):
    # x_ref: (tm, tk) tile.  w_ref/b_ref: (tm, 1) per-row columns (path A)
    # or (1, tk) per-element rows (path B); either broadcasts against the
    # tile without a materialized broadcast. Output is cast back to x dtype.
    o_ref[...] = (x_ref[...] * w_ref[...] + b_ref[...]).astype(o_ref.dtype)


def _round_up(v, m):
    return ((v + m - 1) // m) * m


def scale_shift(x, weight, bias, *, max_block_bytes=4 << 20):
    """out[n, c, ...] = x[n, c, ...] * weight[c] + bias[c] (channel axis = 1)."""
    assert x.ndim >= 2, "expected (N, C, ...) input"
    N, C = x.shape[0], x.shape[1]
    assert weight.shape == (C,) and bias.shape == (C,)

    S = int(math.prod(x.shape[2:]))  # spatial size (1 for 2-D inputs)
    dtype = x.dtype
    itemsize = jnp.dtype(dtype).itemsize
    # Sub-32-bit dtypes pack along sublanes: keep tm aligned to the packed
    # sublane count (8 for f32, 16 for bf16, 32 for int8/fp8).
    sub_unit = max(8, 32 // itemsize)
    # Scale/shift in f32 (full precision) unless the data is bf16, where bf16
    # params halve vreg pressure at negligible precision cost (v6e/v7x).
    param_dtype = jnp.bfloat16 if dtype == jnp.bfloat16 else jnp.float32

    use_row_path = x.ndim >= 3 and (S % 128 == 0 or S >= 1024)
    if use_row_path:
        # Path A: channel c of sample n becomes row n*C + c (free reshape).
        rows, cols = N * C, S
        x2d = x.reshape(rows, cols)
        w2d = jnp.tile(weight.astype(param_dtype), N).reshape(rows, 1)
        b2d = jnp.tile(bias.astype(param_dtype), N).reshape(rows, 1)
    else:
        # Path B: per-element scale/shift row of length C*S (column c*S + s
        # gets weight[c]); lane-dense even for tiny / odd spatial sizes.
        rows, cols = N, C * S
        x2d = x.reshape(rows, cols)
        w2d = jnp.repeat(weight.astype(param_dtype), S).reshape(1, cols)
        b2d = jnp.repeat(bias.astype(param_dtype), S).reshape(1, cols)

    # Fixed, bounded tiles + cdiv grid; Pallas masks boundary blocks.
    if cols % 128 == 0:
        tk = min(cols, 2048)
    elif cols > 128:
        tk = min((cols // 128) * 128, 2048)  # lane-dense except final block
    else:
        tk = cols                            # tiny last dim: full extent
    tm_cap = max(sub_unit,
                 (max_block_bytes // (tk * itemsize)) // sub_unit * sub_unit)
    tm = rows if rows <= tm_cap else tm_cap  # full extent or sub_unit-aligned

    # v7x megacore: guarantee at least one 'parallel' axis has >= 2 blocks so
    # both TensorCores get work (harmless on single-TC v5e/v6e).
    if pl.cdiv(rows, tm) == 1 and pl.cdiv(cols, tk) == 1:
        if tk >= 256 and tk % 256 == 0:
            tk //= 2
        elif rows > sub_unit:
            tm = _round_up(pl.cdiv(rows, 2), sub_unit)

    # Keep the cols axis (j) as the LAST grid axis: path-A scale/shift blocks
    # are indexed by i only and stay resident across the inner loop.
    grid = (pl.cdiv(rows, tm), pl.cdiv(cols, tk))

    if use_row_path:
        w_spec = pl.BlockSpec((tm, 1), lambda i, j: (i, 0))
        b_spec = pl.BlockSpec((tm, 1), lambda i, j: (i, 0))
    else:
        # (1, tk) param rows: extra traffic is ~2/tm of the x stream.
        w_spec = pl.BlockSpec((1, tk), lambda i, j: (0, j))
        b_spec = pl.BlockSpec((1, tk), lambda i, j: (0, j))

    out2d = pl.pallas_call(
        _scale_shift_kernel,
        out_shape=jax.ShapeDtypeStruct((rows, cols), dtype),
        grid_spec=pltpu.PrefetchScalarGridSpec(
            num_scalar_prefetch=0,
            grid=grid,
            in_specs=[
                pl.BlockSpec((tm, tk), lambda i, j: (i, j)),  # input tile
                w_spec,                                       # scale
                b_spec,                                       # shift
            ],
            out_specs=pl.BlockSpec((tm, tk), lambda i, j: (i, j)),
        ),
        compiler_params=pltpu.CompilerParams(
            dimension_semantics=("parallel", "parallel"),
            # 2 x double-buffered (in + out) 4 MiB blocks ~= 16 MiB; 48 MiB
            # leaves headroom under v7x's 64 MiB physical VMEM and overrides
            # the 16 MiB scoped default on v5e.
            vmem_limit_bytes=48 << 20),
        # Note: input_output_aliases={0: 0} would drop one HBM allocation when
        # the caller donates x; left off so non-donated callers don't pay a
        # defensive copy.
    )(x2d, w2d, b2d)

    return out2d.reshape(x.shape)


if __name__ == "__main__":
    # Module setup: ScaleShift(num_features=4).
    num_features = 4
    key = jax.random.PRNGKey(0)
    kx, kw, kb, kx2, kx3 = jax.random.split(key, 5)

    # reset_parameters(): weight = ones, bias = zeros; perturb deterministically
    # so the test is non-trivial (as folded BatchNorm stats would be).
    weight = jnp.ones((num_features,), jnp.float32) + 0.1 * jax.random.normal(
        kw, (num_features,), jnp.float32)
    bias = jnp.zeros((num_features,), jnp.float32) + 0.1 * jax.random.normal(
        kb, (num_features,), jnp.float32)

    def ref_nchw(xv, w, b):
        bcast = (1, num_features) + (1,) * (xv.ndim - 2)
        return xv * w.reshape(bcast) + b.reshape(bcast)

    # Main case: NCHW, lane-dense spatial (row path A).
    x = jax.random.normal(kx, (2, num_features, 16, 16), jnp.float32)
    out = jax.block_until_ready(scale_shift(x, weight, bias))
    assert out.shape == x.shape and out.dtype == x.dtype
    assert jnp.allclose(out, ref_nchw(x, weight, bias), atol=1e-6, rtol=1e-6)

    # Small / odd spatial (7x7): exercises the (N, C*H*W) row-broadcast path
    # (path B) with a masked boundary column block.
    x2 = jax.random.normal(kx2, (2, num_features, 7, 7), jnp.float32)
    out2 = jax.block_until_ready(scale_shift(x2, weight, bias))
    assert jnp.allclose(out2, ref_nchw(x2, weight, bias), atol=1e-6, rtol=1e-6)

    # 2-D (N, C) input, which the PyTorch module also accepts.
    x3 = jax.random.normal(kx3, (8, num_features), jnp.float32)
    out3 = jax.block_until_ready(scale_shift(x3, weight, bias))
    assert jnp.allclose(out3, x3 * weight[None, :] + bias[None, :],
                        atol=1e-6, rtol=1e-6)

    print("KERNEL_OK")
</pallas_src>

<mosaic_0001>
module attributes {stable_mosaic.version = 11 : i64} {
  func.func @_scale_shift_kernel(%arg0: i32, %arg1: i32, %arg2: memref<8x128xf32, #tpu.memory_space<vmem>>, %arg3: memref<8x1xf32, #tpu.memory_space<vmem>>, %arg4: memref<8x1xf32, #tpu.memory_space<vmem>>, %arg5: memref<8x128xf32, #tpu.memory_space<vmem>>) attributes {dimension_semantics = [#tpu.dimension_semantics<parallel>, #tpu.dimension_semantics<parallel>], iteration_bounds = array<i64: 1, 2>, scalar_prefetch = 0 : i64, scratch_operands = 0 : i64, tpu.core_type = #tpu.core_type<tc>, window_params = [{transform_indices = @transform_0, window_bounds = array<i64: 8, 128>}, {transform_indices = @transform_1, window_bounds = array<i64: 8, 1>}, {transform_indices = @transform_2, window_bounds = array<i64: 8, 1>}, {transform_indices = @transform_3, window_bounds = array<i64: 8, 128>}]} {
    %c0 = arith.constant 0 : index
    %c0_0 = arith.constant 0 : index
    %0 = vector.load %arg2[%c0, %c0_0] : memref<8x128xf32, #tpu.memory_space<vmem>>, vector<8x128xf32>
    %c0_1 = arith.constant 0 : index
    %c0_2 = arith.constant 0 : index
    %1 = vector.load %arg3[%c0_1, %c0_2] : memref<8x1xf32, #tpu.memory_space<vmem>>, vector<8x1xf32>
    %2 = vector.broadcast %1 : vector<8x1xf32> to vector<8x128xf32>
    %3 = arith.mulf %0, %2 : vector<8x128xf32>
    %c0_3 = arith.constant 0 : index
    %c0_4 = arith.constant 0 : index
    %4 = vector.load %arg4[%c0_3, %c0_4] : memref<8x1xf32, #tpu.memory_space<vmem>>, vector<8x1xf32>
    %5 = vector.broadcast %4 : vector<8x1xf32> to vector<8x128xf32>
    %6 = arith.addf %3, %5 : vector<8x128xf32>
    %c0_5 = arith.constant 0 : index
    %c0_6 = arith.constant 0 : index
    %7 = vector.load %arg5[%c0_5, %c0_6] : memref<8x128xf32, #tpu.memory_space<vmem>>, vector<8x128xf32>
    tpu.vector_store %arg5[%c0_5, %c0_6], %6 {strides = array<i32>} : memref<8x128xf32, #tpu.memory_space<vmem>>, vector<8x128xf32>,
    return
  }
  func.func @transform_0(%arg0: i32, %arg1: i32) -> (i32, i32) {
    %c0_i32 = arith.constant 0 : i32
    return %arg0, %arg1 : i32, i32
  }
  func.func @transform_1(%arg0: i32, %arg1: i32) -> (i32, i32) {
    %c0_i32 = arith.constant 0 : i32
    %c0_i32_0 = arith.constant 0 : i32
    return %arg0, %c0_i32 : i32, i32
  }
  func.func @transform_2(%arg0: i32, %arg1: i32) -> (i32, i32) {
    %c0_i32 = arith.constant 0 : i32
    %c0_i32_0 = arith.constant 0 : i32
    return %arg0, %c0_i32 : i32, i32
  }
  func.func @transform_3(%arg0: i32, %arg1: i32) -> (i32, i32) {
    %c0_i32 = arith.constant 0 : i32
    return %arg0, %arg1 : i32, i32
  }
}

</mosaic_0001>

<bundles_post_ra>
// kernel: tpu_custom_call.1
= control target key start
LH: loop header
LB: loop body
LE: loop exit
PB: predicated region body
PF: predicated region fallthrough
CT: control target
= control target key end

     0   :  { %8 = vsyncpa [#allocation3], 0  ;;  %s641_s0 = inlined_call_operand.vmem [shape: f32[8,256], index: 0, kind: input, shape index: {}]   ;;  %s642_s1 = inlined_call_operand.vmem [shape: f32[8,1], index: 1, kind: input, shape index: {}]   ;;  %s643_s2 = inlined_call_operand.vmem [shape: f32[8,1], index: 2, kind: input, shape index: {}]   ;;  %s644_s3 = inlined_call_operand.hbm [shape: f32[8,256], index: 3, kind: output, shape index: {}]  }
   0x1   :  { %10 = vsyncpa [#allocation3 + $0x1], 0  ;;  %s538_s12 = smov 0   ;;  %s540_s13 = smov 0  }
   0x2   :  { %s542_s14 = smov 0   ;;  %s544_s15 = smov 0  }
   0x3   :  { %s546_s16 = smov 0   ;;  %s548_s17 = smov 0  }
   0x4 LB: > { %s367_s18 = sadd.s32 4294967295, %s515_s17   ;;  %s368_s19 = sadd.s32 4294967294, %s515_s17   ;;  %s515_s17 = sphi %s548_s17, %s16_s17   ;;  %s511_s16 = sphi %s546_s16, %s651_s16   ;;  %s507_s15 = sphi %s544_s15, %s650_s15   ;;  %s503_s14 = sphi %s542_s14, %s649_s14   ;;  %s499_s13 = sphi %s540_s13, %s648_s13   ;;  %s495_s12 = sphi %s538_s12, %s647_s12  }
   0x5   : > { %s25_s20 = sadd.s32 1, %s511_s16  ;;  %s117_s21 = sadd.s32 1, %s503_s14 }
   0x6   : > { %p26_p0 = scmp.ge.s32.totalorder %s25_s20, 2  ;;  %p127_p1 = scmp.ne.s32.totalorder %s503_s14, %s499_s13 }
   0x7   : > { %p128_p2 = scmp.eq.s32.totalorder %s367_s18, 1  ;;  %p133_p3 = scmp.ne.s32.totalorder %s499_s13, %s495_s12 }
   0x8   : > { %s653_s20 = smov (%p26_p0, %s25_s20), 0  ;;  %p134_p5 = scmp.eq.s32.totalorder %s368_s19, 1 }
   0x9   : > { %p578_p4 = por %p128_p2, %p127_p1  ;;  %s113_s23 = ssub.s32 %s511_s16, %s653_s20 }
   0xa   : > { %p373_p6 = scmp.ge.s32.totalorder %s515_s17, 1  ;;  %p115_p7 = scmp.eq.s32.totalorder %s113_s23, 0 }
   0xb   : > { %p585_p8 = por %p134_p5, %p133_p3  ;;  %p177_p9 = scmp.lt.s32.totalorder %s515_s17, 3 }
   0xc   : > { %s591_s25 = scalar_select %p115_p7, %s503_s14, %s117_s21  }
   0xd   : > { %p178_p10 = pnand %p373_p6, %p177_p9 }
   0xe   : > { %p214_p11 = scmp.lt.s32.totalorder (!%p178_p10), %s507_s15, 1  ;;  %s209_s4 = sand.u32 (!%p178_p10), 1, %s499_s13  }
   0xf   : > { %181 = sbr.rel (%p178_p10) target bundleno = 150 (0x96), region = 32  ;;  %s374_s6 = sshll.u32 (!%p178_p10), %s209_s4, 3 }
  0x10   : > { %s377_s7 = sshll.u32 (!%p178_p10), %s507_s15, 3  ;;  %s211_s21 = scalar_lea.vmem (!%p178_p10), [#allocation2], %s374_s6 }
  0x11   : > { %s257_s19 = scalar_lea.hbm (!%p178_p10), %s644_s3, %s377_s7  ;;  %s259_s23 = sshll.u32 (!%p178_p10), %s211_s21, 4  ;;  %s260_s23 = int_to_ptr.vmem [resolvable:$true] %s259_s23 }
  0x12   : > { %s261_s26 = sshll.u32 (!%p178_p10), %s257_s19, 4  ;;  %s262_s26 = int_to_ptr.hbm [resolvable:$true] %s261_s26 }
  0x13   : > { %s451_s27 = sshra.s32 (!%p178_p10), %s262_s26, 4  ;;  %s452_s27 = int_to_ptr.hbm [resolvable:$true] %s451_s27 }
  0x14   : > { %v229_v0 = vld [vmem:[%s642_s1] sm:$0xff]  ;;  %v517_v1 = vmov 0   ;;  %s215_s30 = scalar_select %p214_p11, %s507_s15, 1 }
  0x15   : > { %436 = vset.pattern.permute.xlu0 %v517_v1  ;;  %v236_v2 = vld [vmem:[%s643_s2] sm:$0xff]  ;;  %s245_s15 = scalar_lea.sflag [#allocation3], %s209_s4  ;;  %s453_s28 = scalar_lea.hbm %s452_s27, 8 }
  0x16   : > { %232 = vperm.xlu0 %436, %v229_v0   ;;  %s375_s5 = sshll.u32 %s215_s30, 3  ;;  %p454_p12 = scmp.ne.s32.totalorder %s452_s27, %s453_s28 }
  0x17   : > { %s219_s10 = scalar_lea.vmem %s641_s0, %s375_s5  ;;  %s457_s5 = scalar_lea.hbm %s644_s3, 16 }
  0x18   : > { %v228_v4 = vld [vmem:[%s219_s10] sm:$0xff]  ;;  %p455_p13 = pnand %p454_p12, %p578_p4  ;;  %p458_p1 = scmp.lt.s32.totalorder %s452_s27, %s644_s3 }
  0x19   : > { %p459_p2 = scmp.lt.s32.totalorder %s457_s5, %s453_s28 }
  0x1a   : > { %p456_p0 = pneg %p455_p13 }
  0x1b   : > { %p460_p3 = por %p459_p2, %p458_p1 }
  0x1d   : > { %p461_p5 = pnand %p460_p3, %p456_p0 }
  0x1e   : > { %239 = vperm.xlu0 %436, %v236_v2  }
  0x88   : > { %v233_v3 = vpop.permute.xlu0 %232 }
  0x89   : > { %v235_v5 = vmul.f32 %v233_v3, %v228_v4 }
  0x90   : > { %v240_v6 = vpop.permute.xlu0 %239 }
  0x91   : > { %v242_v7 = vadd.f32 %v240_v6, %v235_v5 }
  0x93   : > { %243 = vst [vmem:[%s211_s21] sm:$0xff] %v242_v7 }
  0x94   : > { %464 = shalt.err (!%p461_p5)
}
  0x95   : > { %380 = dma.vmem_to_hbm [thread:$0]  (%p578_p4), %s260_s23, 128, %s262_s26, %s245_s15  }
  0x96 PF: > { %p386_p6 = scmp.ge.s32.totalorder %s515_s17, 2  ;;  %s273_s4 = sand.u32 1, %s495_s12  }
  0x97   : > { %s274_s8 = scalar_lea.sflag [#allocation3], %s273_s4 }
  0x98   : > { %p383_p7 = pnand %p386_p6, %p585_p8 }
  0x9a   : > { %p384_p9 = pneg %p383_p7 }
  0x9c   : > { %490 = dma.done.wait (%p384_p9), %s274_s8, 128  }
  0x9d   : > { %492 = vsyncadd (%p384_p9), %s274_s8, 4294967168  ;;  %s16_s17 = sadd.s32 1, %s515_s17   ;;  %s647_s12 = smov %s499_s13 }
  0x9e   : > { %p13_p10 = scmp.ge.s32.totalorder %s16_s17, 4   ;;  %s648_s13 = smov %s503_s14 }
  0x9f   : > { %s649_s14 = smov %s591_s25  ;;  %s650_s15 = smov %s511_s16 }
  0xa0   : > { %s651_s16 = smov %s653_s20  ;;  %15 = sbr.rel (!%p13_p10) target bundleno = 4 (0x4), region = 73 }
  0xa5   :  { %280 = vsyncpa [#allocation3], 1 }
  0xa6   :  { %282 = vsyncpa [#allocation3 + $0x1], 1 }

</bundles_post_ra>
